<compile_context>
chip_gen: v7x
topology: tpu7x:2x2x1
jax: 0.10.0
libtpu: 0.0.40
codegen_flags: <defaults>
</compile_context>

<pallas_src>
import functools

import jax
import jax.numpy as jnp
from jax.experimental import pallas as pl
from jax.experimental.pallas import tpu as pltpu


def custom_loss_kernel(outputs_ref, target_ref, sim_ref, out_ref, *, batch_size):
    i = pl.program_id(0)
    x = outputs_ref[...].astype(jnp.float32)          # (TB, C)
    t = target_ref[...]                               # (TB, 1) int32
    tb, c = x.shape

    # Mask rows past the true batch size (wrapper-side zero padding of last tile).
    row_ids = i * tb + jax.lax.broadcasted_iota(jnp.int32, (tb, 1), 0)
    valid = row_ids < batch_size                      # (TB, 1) bool

    # pred = F.log_softmax(outputs, dim=-1)  (f32 math; pad rows are all-zero
    # so the softmax stays finite and is masked out below).
    m = jnp.max(x, axis=-1, keepdims=True)
    shifted = x - m
    lse = jnp.log(jnp.sum(jnp.exp(shifted), axis=-1, keepdims=True))
    pred = shifted - lse                              # (TB, C)
    # NOTE: F.softmax(outputs) in the reference forward is dead code (unused).

    # similarity_row = similarity_matrix[target] as a one-hot MXU matmul
    # (no dynamic gather).  One-hot is 0/1, so building it in sim's dtype is
    # exact and keeps the matmul at native MXU rate for bf16 parameters.
    col_ids = jax.lax.broadcasted_iota(jnp.int32, (tb, c), 1)
    onehot = (col_ids == t).astype(sim_ref.dtype)     # (TB, C)
    sim_rows = jnp.dot(onehot, sim_ref[...],
                       preferred_element_type=jnp.float32)  # (TB, C) f32

    # sum over classes, then partial sum over this batch tile (pad rows masked).
    per_row = jnp.sum(pred * sim_rows, axis=-1, keepdims=True)        # (TB, 1)
    partial = jnp.sum(jnp.where(valid, per_row, 0.0), keepdims=True)  # (1, 1)

    # Lane-dense (8,128) output block (unmasked vst); wrapper reads [g, 0, 0].
    out_ref[...] = jnp.broadcast_to(partial, out_ref.shape)


def _pick_tile_b(B, C):
    # Keep 2 (double-buffer) x TB x C x 4B of logits around ~8 MiB so the tile
    # fits comfortably inside the scoped VMEM limit on v5e/v6e and the smaller
    # 64 MiB VMEM of v7x, while still being large enough to hide DMA latency.
    cap = (8 * 1024 * 1024) // (2 * max(C, 1) * 4)
    cap = max(8, (cap // 8) * 8)
    cap = min(cap, 1024)
    if B <= cap:
        return B          # block == full dim: always a legal block shape
    return cap            # multiple of 8; last tile padded + masked


def custom_loss(outputs, target, similarity_matrix, *, tile_b=None):
    B, C = outputs.shape
    TB = tile_b if tile_b is not None else _pick_tile_b(B, C)
    TB = min(TB, B) if B < TB else TB
    G = pl.cdiv(B, TB)
    B_pad = G * TB

    target2d = target.astype(jnp.int32).reshape(B, 1)
    if B_pad != B:
        # Pad so every block is fully in-bounds (pad rows masked in-kernel).
        outputs = jnp.pad(outputs, ((0, B_pad - B), (0, 0)))
        target2d = jnp.pad(target2d, ((0, B_pad - B), (0, 0)))

    kernel = functools.partial(custom_loss_kernel, batch_size=B)
    partials = pl.pallas_call(
        kernel,
        grid=(G,),
        out_shape=jax.ShapeDtypeStruct((G, 8, 128), jnp.float32),
        in_specs=[
            pl.BlockSpec((TB, C), lambda i: (i, 0)),   # logits tile
            pl.BlockSpec((TB, 1), lambda i: (i, 0)),   # target tile
            pl.BlockSpec((C, C), lambda i: (0, 0)),    # sim: constant block
        ],
        out_specs=pl.BlockSpec((1, 8, 128), lambda i: (i, 0, 0)),
        compiler_params=pltpu.CompilerParams(
            dimension_semantics=("parallel",)),
    )(outputs, target2d, similarity_matrix)

    # Tiny scalar epilogue in XLA: mean over batch, normalize by sum(sum(sim)),
    # negate.  denom is a fixed parameter -> hoisted out of the kernel.
    denom = jnp.sum(similarity_matrix, dtype=jnp.float32)
    total = jnp.sum(partials[:, 0, 0])
    return -(total / B) / denom


def _reference_loss(outputs, target, sim):
    # Pure-JAX reference mirroring the PyTorch forward.
    pred = jax.nn.log_softmax(outputs.astype(jnp.float32), axis=-1)
    sim_rows = sim[target].astype(jnp.float32)
    per_row = jnp.sum(pred * sim_rows, axis=1)
    avg = jnp.mean(per_row)
    return -avg / jnp.sum(sim, dtype=jnp.float32)


if __name__ == "__main__":
    key = jax.random.PRNGKey(0)
    k1, k2, k3, k4, k5 = jax.random.split(key, 5)

    # Primary shapes (small test implied by the module: B=8, C=32).
    B, C = 8, 32
    outputs = jax.random.normal(k1, (B, C), dtype=jnp.float32)
    target = jax.random.randint(k2, (B,), 0, C, dtype=jnp.int32)
    similarity_matrix = jax.random.uniform(
        k3, (C, C), dtype=jnp.float32, minval=0.1, maxval=1.0
    )

    loss = custom_loss(outputs, target, similarity_matrix)
    jax.block_until_ready(loss)
    ref = _reference_loss(outputs, target, similarity_matrix)
    assert jnp.allclose(loss, ref, rtol=1e-5, atol=1e-6), (loss, ref)

    # Secondary check: exercise the batch grid + padding/masking (B=20, TB=8).
    B2 = 20
    outputs2 = jax.random.normal(k4, (B2, C), dtype=jnp.float32)
    target2 = jax.random.randint(k5, (B2,), 0, C, dtype=jnp.int32)
    loss2 = custom_loss(outputs2, target2, similarity_matrix, tile_b=8)
    jax.block_until_ready(loss2)
    ref2 = _reference_loss(outputs2, target2, similarity_matrix)
    assert jnp.allclose(loss2, ref2, rtol=1e-5, atol=1e-6), (loss2, ref2)

    print("KERNEL_OK")
</pallas_src>

<mosaic_0001>
module attributes {stable_mosaic.version = 11 : i64} {
  func.func @custom_loss_kernel(%arg0: i32, %arg1: memref<8x32xf32, #tpu.memory_space<vmem>>, %arg2: memref<8x1xi32, #tpu.memory_space<vmem>>, %arg3: memref<32x32xf32, #tpu.memory_space<vmem>>, %arg4: memref<1x8x128xf32, #tpu.memory_space<vmem>>) attributes {dimension_semantics = [#tpu.dimension_semantics<parallel>], iteration_bounds = array<i64: 1>, scalar_prefetch = 0 : i64, scratch_operands = 0 : i64, tpu.core_type = #tpu.core_type<tc>, window_params = [{transform_indices = @transform_0, window_bounds = array<i64: 8, 32>}, {transform_indices = @transform_1, window_bounds = array<i64: 8, 1>}, {pipeline_mode = #tpu.pipeline_mode<synchronous>, transform_indices = @transform_2, window_bounds = array<i64: 32, 32>}, {transform_indices = @transform_3, window_bounds = array<i64: 1, 8, 128>}]} {
    %c0 = arith.constant 0 : index
    %c0_0 = arith.constant 0 : index
    %0 = vector.load %arg1[%c0, %c0_0] : memref<8x32xf32, #tpu.memory_space<vmem>>, vector<8x32xf32>
    %c0_1 = arith.constant 0 : index
    %c0_2 = arith.constant 0 : index
    %1 = vector.load %arg2[%c0_1, %c0_2] : memref<8x1xi32, #tpu.memory_space<vmem>>, vector<8x1xi32>
    %c8_i32 = arith.constant 8 : i32
    %2 = arith.muli %arg0, %c8_i32 : i32
    %3 = tpu.iota {dimensions = array<i32: 0>} : vector<8x1xi32>
    %4 = vector.broadcast %2 : i32 to vector<8x1xi32>
    %5 = arith.addi %4, %3 : vector<8x1xi32>
    %c8_i32_3 = arith.constant 8 : i32
    %6 = vector.broadcast %c8_i32_3 : i32 to vector<8x1xi32>
    %7 = arith.cmpi slt, %5, %6 : vector<8x1xi32>
    %cst = arith.constant dense<0xFF800000> : vector<8xf32>
    %8 = vector.multi_reduction <maximumf>, %0, %cst [1] : vector<8x32xf32> to vector<8xf32>
    %9 = vector.shape_cast %8 : vector<8xf32> to vector<8x1xf32>
    %10 = vector.broadcast %9 : vector<8x1xf32> to vector<8x32xf32>
    %11 = arith.subf %0, %10 : vector<8x32xf32>
    %12 = math.exp %11 : vector<8x32xf32>
    %cst_4 = arith.constant dense<0.000000e+00> : vector<8xf32>
    %13 = vector.multi_reduction <add>, %12, %cst_4 [1] : vector<8x32xf32> to vector<8xf32>
    %14 = vector.shape_cast %13 : vector<8xf32> to vector<8x1xf32>
    %15 = math.log %14 : vector<8x1xf32>
    %16 = vector.broadcast %15 : vector<8x1xf32> to vector<8x32xf32>
    %17 = arith.subf %11, %16 : vector<8x32xf32>
    %18 = tpu.iota {dimensions = array<i32: 1>} : vector<8x32xi32>
    %19 = vector.broadcast %1 : vector<8x1xi32> to vector<8x32xi32>
    %20 = arith.cmpi eq, %18, %19 : vector<8x32xi32>
    %21 = arith.extui %20 : vector<8x32xi1> to vector<8x32xi32>
    %22 = arith.sitofp %21 : vector<8x32xi32> to vector<8x32xf32>
    %c0_5 = arith.constant 0 : index
    %c0_6 = arith.constant 0 : index
    %23 = vector.load %arg3[%c0_5, %c0_6] : memref<32x32xf32, #tpu.memory_space<vmem>>, vector<32x32xf32>
    %cst_7 = arith.constant dense<0.000000e+00> : vector<8x32xf32>
    %24 = tpu.matmul %22, %23, %cst_7 {dimension_numbers = #tpu.dot_dimension_numbers<[1], [0], [0], [1], [0, 0, 1, 1], [], []>} : vector<8x32xf32>, vector<32x32xf32>, vector<8x32xf32> -> vector<8x32xf32>
    %25 = arith.mulf %17, %24 : vector<8x32xf32>
    %cst_8 = arith.constant dense<0.000000e+00> : vector<8xf32>
    %26 = vector.multi_reduction <add>, %25, %cst_8 [1] : vector<8x32xf32> to vector<8xf32>
    %27 = vector.shape_cast %26 : vector<8xf32> to vector<8x1xf32>
    %cst_9 = arith.constant 0.000000e+00 : f32
    %28 = vector.broadcast %cst_9 : f32 to vector<8x1xf32>
    %29 = arith.select %7, %27, %28 : vector<8x1xi1>, vector<8x1xf32>
    %30 = vector.shape_cast %29 : vector<8x1xf32> to vector<1x8x1xf32>
    %cst_10 = arith.constant dense<0.000000e+00> : vector<1xf32>
    %31 = vector.multi_reduction <add>, %30, %cst_10 [1, 2] : vector<1x8x1xf32> to vector<1xf32>
    %32 = vector.shape_cast %31 : vector<1xf32> to vector<1x1x1xf32>
    %33 = vector.extract %32[0, 0, 0] : f32 from vector<1x1x1xf32>
    %34 = vector.broadcast %33 : f32 to vector<1x1xf32>
    %35 = vector.shape_cast %34 : vector<1x1xf32> to vector<1x1x1xf32>
    %36 = vector.broadcast %35 : vector<1x1x1xf32> to vector<1x8x128xf32>
    %c0_11 = arith.constant 0 : index
    %c0_12 = arith.constant 0 : index
    %c0_13 = arith.constant 0 : index
    %37 = vector.load %arg4[%c0_11, %c0_12, %c0_13] : memref<1x8x128xf32, #tpu.memory_space<vmem>>, vector<1x8x128xf32>
    tpu.vector_store %arg4[%c0_11, %c0_12, %c0_13], %36 {strides = array<i32>} : memref<1x8x128xf32, #tpu.memory_space<vmem>>, vector<1x8x128xf32>,
    return
  }
  func.func @transform_0(%arg0: i32) -> (i32, i32) {
    %c0_i32 = arith.constant 0 : i32
    %c0_i32_0 = arith.constant 0 : i32
    return %arg0, %c0_i32 : i32, i32
  }
  func.func @transform_1(%arg0: i32) -> (i32, i32) {
    %c0_i32 = arith.constant 0 : i32
    %c0_i32_0 = arith.constant 0 : i32
    return %arg0, %c0_i32 : i32, i32
  }
  func.func @transform_2(%arg0: i32) -> (i32, i32) {
    %c0_i32 = arith.constant 0 : i32
    %c0_i32_0 = arith.constant 0 : i32
    %c0_i32_1 = arith.constant 0 : i32
    return %c0_i32, %c0_i32_0 : i32, i32
  }
  func.func @transform_3(%arg0: i32) -> (i32, i32, i32) {
    %c0_i32 = arith.constant 0 : i32
    %c0_i32_0 = arith.constant 0 : i32
    %c0_i32_1 = arith.constant 0 : i32
    return %arg0, %c0_i32, %c0_i32_0 : i32, i32, i32
  }
}

</mosaic_0001>

<bundles_post_ra>
// kernel: tpu_custom_call.1
= control target key start
LH: loop header
LB: loop body
LE: loop exit
PB: predicated region body
PF: predicated region fallthrough
CT: control target
= control target key end

     0   :  { %8 = vsyncpa [#allocation3], 0  ;;  %s317_s0 = inlined_call_operand.vmem [shape: f32[8,32], index: 0, kind: input, shape index: {}]   ;;  %s318_s1 = inlined_call_operand.vmem [shape: s32[8,1], index: 1, kind: input, shape index: {}]   ;;  %s319_s2 = inlined_call_operand.hbm [shape: f32[32,32], index: 2, kind: input, shape index: {}]   ;;  %s320_s3 = inlined_call_operand.hbm [shape: f32[1,8,128], index: 3, kind: output, shape index: {}]  }
   0x1   :  { %9 = vsyncpa [#allocation4], 0  ;;  %s255_s12 = smov [#allocation2]   ;;  %s207_s16 = scalar_lea.hbm %s319_s2, 512 }
   0x2   :  { %s19_s13 = sshll.u32 %s255_s12, 4  ;;  %p208_p0 = scmp.ne.s32.totalorder %s319_s2, %s207_s16  ;;  %s20_s13 = int_to_ptr.vmem [resolvable:$true] %s19_s13 }
   0x3   :  { %p211_p1 = scmp.lt.u32.totalorder %s207_s16, %s319_s2 }
   0x5   :  { %p213_p2 = pnand %p211_p1, %p208_p0 }
   0x7   :  { %216 = shalt.err (!%p213_p2)
}
   0x8   :  { %s217_s21 = scalar_lea.vmem %s20_s13, 512  ;;  %p222_p4 = scmp.lt.s32.totalorder %s20_s13, %s20_s13 }
   0x9   :  { %p218_p3 = scmp.ne.s32.totalorder %s20_s13, %s217_s21  ;;  %p223_p5 = scmp.lt.s32.totalorder %s217_s21, %s217_s21 }
   0xb   :  { %p224_p6 = por %p223_p5, %p222_p4 }
   0xd   :  { %p225_p7 = pnand %p224_p6, %p218_p3 }
   0xf   :  { %228 = shalt.err (!%p225_p7)
}
  0x10   :  { %s256_s22 = smov 128   ;;  %s257_s23 = smov 8  }
  0x11   :  { %25 = dma.hbm_to_vmem [thread:$0]  %s319_s2, 512, %s20_s13, [#allocation3], %s256_s22, %s256_s22, %s257_s23  }
  0x12   :  { %251 = dma.done.wait [#allocation3], 512  }
  0x13   :  { %252 = vsyncadd [#allocation3], 4294966784  ;;  %v258_v0 = vmov 0   ;;  %v259_v1 = vmov 0.0|0.0   ;;  %v30_v2 = vld [vmem:[%s318_s1] sm:$0xff]  ;;  %v59_v4 = vld [vmem:[#allocation2 + $0x8] sm:$0xff]  ;;  %v50_v12 = vlaneseq }
  0x14   :  { %202 = vset.pattern.permute.xlu0 %v258_v0  ;;  %186 = vmatprep.subr.bf16.mxu0 %v259_v1  ;;  %v58_v3 = vld [vmem:[#allocation2] sm:$0xff]  ;;  %v60_v5 = vld [vmem:[#allocation2 + $0x10] sm:$0xff]  ;;  %v61_v6 = vld [vmem:[#allocation2 + $0x18] sm:$0xff]  ;;  %vm260_vm0 = vmmov 0   ;;  %v261_v8 = vmov 0.0   ;;  %vm37_vm1 = vcmask 261120  }
  0x15   :  { %53 = vperm.xlu0 %202, %v30_v2   ;;  %v187_v7 = vpack.c.bf16 %v59_v4, %v58_v3  ;;  %183 = vmatprep.mubr.msk.f32.mxu0 %vm260_vm0, %v261_v8  ;;  %v190_v9 = vpack.c.bf16 %v61_v6, %v60_v5  ;;  %v29_v10 = vld [vmem:[%s317_s0] sm:$0xff]  ;;  %v51_v13 = vand.u32 127, %v50_v12  ;;  %vm140_vm3 = vcmask 7168   ;;  %s262_s0 = smov [#allocation5]  }
  0x16   :  { %v38_v11 = vsel %vm37_vm1, %v29_v10, -inf  ;;  %s159_s1 = sshll.u32 %s262_s0, 4  ;;  %s160_s1 = int_to_ptr.vmem [resolvable:$true] %s159_s1 }
  0x17   :  { %188 = vmatpush3.bf16.msra.mxu0 %v187_v7  ;;  %s229_s30 = scalar_lea.vmem %s160_s1, 128  ;;  %p234_p9 = scmp.lt.s32.totalorder %s160_s1, %s160_s1 }
  0x18   :  { %189 = vmatprep.subr.bf16.mxu0 %v259_v1  ;;  %p230_p8 = scmp.ne.s32.totalorder %s160_s1, %s229_s30  ;;  %p235_p10 = scmp.lt.s32.totalorder %s229_s30, %s229_s30 }
  0x1a   :  { %p236_p11 = por %p235_p10, %p234_p9 }
  0x1b   :  { %191 = vmatpush3.bf16.msra.mxu0 %v190_v9 }
  0x1c   :  { %p237_p12 = pnand %p236_p11, %p230_p8 }
  0x34   :  { %39 = vmax.xlane.f32.xlu0 %v38_v11 }
  0x94   :  { %v54_v14 = vpop.permute.xlu0 %53 }
  0x95   :  { %vm55_vm2 = vcmp.eq.s32.totalorder %v51_v13, %v54_v14 }
  0x96   :  { %v168_v15 = vsel %vm55_vm2, 1.0, %v261_v8 }
  0x97   :  { %184 = vmatmul.mubr.msk.f32.vlgmr.msra.gmra.mrb[0].mxu0 %vm37_vm1, %v168_v15 }
  0xc1   :  { %v40_v16 = vpop.xlane.xlu0 %39 }
  0xc2   :  { %v41_v17 = vsub.f32 %v29_v10, %v40_v16 }
  0xc4   :  { %v42_v18 = vmul.f32 1.442695, %v41_v17 }
  0xc6   :  { %203 = vpow2.f32 %v42_v18 }
  0xd0   :  { %v204_v19 = vpop.eup %203 }
  0xd1   :  { %v44_v20 = vsel %vm37_vm1, %v204_v19, 0.0 }
  0xd2   :  { %45 = vadd.xlane.f32.xlu1 %v44_v20 }
 0x15f   :  { %v46_v21 = vpop.xlane.xlu1 %45 }
 0x160   :  { %205 = vlog2.f32 %v46_v21 }
 0x16a   :  { %v206_v22 = vpop.eup %205  ;;  %v131_v23 = vpop.f32.mrb[0].mxu0 }
 0x16b   :  { %v48_v24 = vmul.f32 0.6931472, %v206_v22  ;;  %v185_v25 = vpop.f32.mrb[1].mxu0 }
 0x16d   :  { %v49_v26 = vsub.f32 %v41_v17, %v48_v24 }
 0x16f   :  { %v135_v27 = vmul.f32 %v131_v23, %v49_v26 }
 0x171   :  { %v136_v28 = vsel %vm37_vm1, %v135_v27, 0.0 }
 0x172   :  { %137 = vadd.xlane.f32.xlu1 %v136_v28 }
 0x1ff   :  { %v138_v29 = vpop.xlane.xlu1 %137 }
 0x200   :  { %v141_v30 = vsel %vm140_vm3, %v138_v29, 0.0 }
 0x201   :  { %142 = vadd.xlane.f32.xlu1 %v141_v30 }
 0x28e   :  { %v143_v31 = vpop.xlane.xlu1 %142 }
 0x28f   :  { %v144_v32 = vrot.slane %v143_v31, 4 }
 0x291   :  { %v145_v33 = vadd.f32 %v144_v32, %v143_v31 }
 0x293   :  { %v146_v34 = vrot.slane %v145_v33, 2 }
 0x295   :  { %v147_v35 = vadd.f32 %v146_v34, %v145_v33 }
 0x297   :  { %v148_v36 = vrot.slane %v147_v35, 1 }
 0x299   :  { %v149_v37 = vadd.f32 %v148_v36, %v147_v35 }
 0x29b   :  { %192 = vpush %v149_v37 }
 0x2cc   :  { %s193_s29 = spop %192 }
 0x2cd   :  { %v151_v38 = vstv %s193_s29 }
 0x2ce   :  { %152 = vst [vmem:[#allocation5] sm:$0xff] %v151_v38 }
 0x2cf   :  { %240 = shalt.err (!%p237_p12)
}
 0x2d0   :  { %s241_s6 = scalar_lea.hbm %s320_s3, 128 }
 0x2d1   :  { %p242_p13 = scmp.ne.s32.totalorder %s320_s3, %s241_s6  ;;  %p245_p0 = scmp.lt.u32.totalorder %s241_s6, %s320_s3 }
 0x2d3   :  { %p247_p1 = pnand %p245_p0, %p242_p13 }
 0x2d5   :  { %250 = shalt.err (!%p247_p1)
}
 0x2d6   :  { %162 = dma.vmem_to_hbm [thread:$0]  %s160_s1, 128, %s320_s3, [#allocation4]  }
 0x2d7   :  { %253 = dma.done.wait [#allocation4], 128  }
 0x2d8   :  { %254 = vsyncadd [#allocation4], 4294967168 }
 0x2d9   :  { %166 = vsyncpa [#allocation3], 1 }
 0x2da   :  { %167 = vsyncpa [#allocation4], 1 }

</bundles_post_ra>
